<compile_context>
chip_gen: v7x
topology: tpu7x:2x2x1
jax: 0.10.0
libtpu: 0.0.40
codegen_flags: <defaults>
</compile_context>

<pallas_src>
import jax
import jax.numpy as jnp
from jax.experimental import pallas as pl
from jax.experimental.pallas import tpu as pltpu

_LANE = 128
_SUBLANE = 8


def _round_up(x, m):
    return ((x + m - 1) // m) * m


# --------------------------------------------------------------------------
# Kernel: one batch tile of   out = relu(x @ W1 + b1) @ W2 + b2
# --------------------------------------------------------------------------
def _mlp_kernel(x_ref, w1_ref, b1_ref, w2_ref, b2_ref, o_ref):
    cd = w1_ref.dtype                                  # MXU operand dtype (bf16/f32)
    x = x_ref[...].astype(cd)
    # hidden = relu(x @ W1 + b1)   -- f32 accumulate + f32 epilogue
    h = jnp.dot(x, w1_ref[...], preferred_element_type=jnp.float32)
    h = jnp.maximum(h + b1_ref[...], 0.0)
    # out = hidden @ W2 + b2       -- no activation (matches Net.forward)
    y = jnp.dot(h.astype(w2_ref.dtype), w2_ref[...],
                preferred_element_type=jnp.float32)
    y = y + b2_ref[...]
    o_ref[...] = y.astype(o_ref.dtype)


# --------------------------------------------------------------------------
# One-time parameter preparation (hoisted out of the per-step forward call)
# --------------------------------------------------------------------------
def prepare_params(w1, b1, w2, b2, *, compute_dtype=jnp.bfloat16,
                   pad_output=False):
    """Pad hidden dim to 128 lanes, optionally pad output dim, cast MXU weight
    operands to `compute_dtype`.  Biases stay f32 (f32 epilogue)."""
    F, H = w1.shape
    O = w2.shape[1]
    H_pad = _round_up(H, _LANE)
    O_store = _round_up(O, _LANE) if pad_output else O
    cd = jnp.dtype(compute_dtype)

    w1_p = jnp.zeros((F, H_pad), cd).at[:, :H].set(jnp.asarray(w1).astype(cd))
    b1_p = jnp.zeros((1, H_pad), jnp.float32).at[:, :H].set(
        jnp.asarray(b1, jnp.float32).reshape(1, H))
    w2_p = jnp.zeros((H_pad, O_store), cd).at[:H, :O].set(
        jnp.asarray(w2).astype(cd))
    b2_p = jnp.zeros((1, O_store), jnp.float32).at[:, :O].set(
        jnp.asarray(b2, jnp.float32).reshape(1, O))

    return {"w1": w1_p, "b1": b1_p, "w2": w2_p, "b2": b2_p,
            "n_hidden": H, "n_output": O}


# --------------------------------------------------------------------------
# Tile / VMEM sizing helpers
# --------------------------------------------------------------------------
def _vmem_limit_bytes():
    try:
        cap = int(pltpu.get_tpu_info().vmem_capacity_bytes)
    except Exception:
        cap = 64 * 1024 * 1024          # conservative fallback (v7x per-core)
    return int(min(0.75 * cap, 100 * 1024 * 1024))


def _select_tile_b(B, F, H_pad, O_store, weight_bytes, tile_b, vmem_budget):
    B8 = _round_up(B, _SUBLANE)
    # >= 2 grid steps whenever the batch allows it (keeps both v7x TCs busy).
    tb = min(_round_up(tile_b, _SUBLANE),
             _round_up(pl.cdiv(B8, 2), _SUBLANE),
             B8)
    tb = max(tb, _SUBLANE)

    def footprint(t):
        xbuf = 2 * t * F * 4                 # double-buffered x tile (f32)
        obuf = 2 * t * O_store * 4           # double-buffered out tile (f32)
        tmp = t * (H_pad + O_store) * 4      # fused f32 intermediates
        return xbuf + obuf + tmp + weight_bytes

    while tb > _SUBLANE and footprint(tb) > vmem_budget:
        tb = max(_SUBLANE, (tb // 2 // _SUBLANE) * _SUBLANE)
    return tb


# --------------------------------------------------------------------------
# pallas_call launcher
# --------------------------------------------------------------------------
def _launch(x, w1_p, b1_p, w2_p, b2_p, *, tb, grid, single_buffer_weights,
            vmem_limit, cost):
    B, F = x.shape
    H_pad = w1_p.shape[1]
    O_store = w2_p.shape[1]

    def resident(shape):
        # constant index_map -> stays in VMEM across grid steps
        if single_buffer_weights:
            return pl.BlockSpec(shape, lambda i: (0, 0),
                                pipeline_mode=pl.Buffered(1))
        return pl.BlockSpec(shape, lambda i: (0, 0))

    return pl.pallas_call(
        _mlp_kernel,
        out_shape=jax.ShapeDtypeStruct((B, O_store), jnp.float32),
        grid=grid,
        in_specs=[
            pl.BlockSpec((tb, F), lambda i: (i, 0)),     # x tiles march over batch
            resident((F, H_pad)),                        # W1
            resident((1, H_pad)),                        # b1
            resident((H_pad, O_store)),                  # W2
            resident((1, O_store)),                      # b2
        ],
        out_specs=pl.BlockSpec((tb, O_store), lambda i: (i, 0)),
        compiler_params=pltpu.CompilerParams(
            dimension_semantics=("parallel",),           # shard batch across TCs
            vmem_limit_bytes=vmem_limit,
        ),
        cost_estimate=cost,
    )(x, w1_p, b1_p, w2_p, b2_p)


def net_forward(x, params, *, tile_b=512):
    """Forward pass of Net as a single fused, batch-tiled Pallas kernel.

    x      : (B, n_feature) float32
    params : output of prepare_params(...)
    returns (B, n_output) float32
    """
    w1_p, b1_p, w2_p, b2_p = params["w1"], params["b1"], params["w2"], params["b2"]
    H, O = params["n_hidden"], params["n_output"]
    B, F = x.shape
    H_pad = w1_p.shape[1]
    O_store = w2_p.shape[1]

    vmem_limit = _vmem_limit_bytes()
    # conservative (double-buffered) resident weight/bias footprint
    weight_bytes = (2 * (F * H_pad + H_pad * O_store) * w1_p.dtype.itemsize
                    + 2 * (H_pad + O_store) * 4)
    tb = _select_tile_b(B, F, H_pad, O_store, weight_bytes, tile_b,
                        int(0.8 * vmem_limit))
    grid = (pl.cdiv(B, tb),)

    cost = pl.CostEstimate(
        flops=2 * B * (F * H + H * O),
        transcendentals=0,
        bytes_accessed=(x.size * x.dtype.itemsize
                        + w1_p.size * w1_p.dtype.itemsize
                        + w2_p.size * w2_p.dtype.itemsize
                        + B * O_store * 4),
    )

    try:
        out = _launch(x, w1_p, b1_p, w2_p, b2_p, tb=tb, grid=grid,
                      single_buffer_weights=True, vmem_limit=vmem_limit,
                      cost=cost)
        out = jax.block_until_ready(out)
    except Exception:
        # Fallback if pipeline_mode=pl.Buffered(1) is unsupported in this jax.
        out = _launch(x, w1_p, b1_p, w2_p, b2_p, tb=tb, grid=grid,
                      single_buffer_weights=False, vmem_limit=vmem_limit,
                      cost=cost)

    return out if O_store == O else out[:, :O]


# --------------------------------------------------------------------------
# Parameter init mimicking torch.nn.Linear's U(-1/sqrt(fan_in), +1/sqrt(fan_in))
# --------------------------------------------------------------------------
def init_params(key, n_feature, n_hidden, n_output):
    k1, k2, k3, k4 = jax.random.split(key, 4)
    bound1 = 1.0 / jnp.sqrt(jnp.float32(n_feature))
    bound2 = 1.0 / jnp.sqrt(jnp.float32(n_hidden))
    w1 = jax.random.uniform(k1, (n_feature, n_hidden), jnp.float32,
                            minval=-bound1, maxval=bound1)
    b1 = jax.random.uniform(k2, (1, n_hidden), jnp.float32,
                            minval=-bound1, maxval=bound1)
    w2 = jax.random.uniform(k3, (n_hidden, n_output), jnp.float32,
                            minval=-bound2, maxval=bound2)
    b2 = jax.random.uniform(k4, (1, n_output), jnp.float32,
                            minval=-bound2, maxval=bound2)
    return w1, b1, w2, b2


if __name__ == "__main__":
    # Small shapes consistent with Net(n_feature, n_hidden, n_output)
    B, n_feature, n_hidden, n_output = 64, 16, 32, 4

    key = jax.random.PRNGKey(0)
    kx, kp = jax.random.split(key)
    x = jax.random.normal(kx, (B, n_feature), jnp.float32)
    w1, b1, w2, b2 = init_params(kp, n_feature, n_hidden, n_output)

    # Pure-JAX reference of the same forward semantics.
    ref = jnp.maximum(x @ w1 + b1, 0.0) @ w2 + b2

    # 1) Default path: bf16 MXU operands, f32 accumulate, true-width output.
    params_bf16 = prepare_params(w1, b1, w2, b2)
    out = jax.block_until_ready(net_forward(x, params_bf16))
    assert out.shape == (B, n_output)
    assert jnp.allclose(out, ref, atol=3e-2, rtol=3e-2)

    # 2) f32 path for a tight numeric check; ragged batch (B=50, tile=32)
    #    exercises the cdiv grid / masked last block (no padded x copy).
    params_f32 = prepare_params(w1, b1, w2, b2, compute_dtype=jnp.float32)
    x_ragged = x[:50]
    out_f32 = jax.block_until_ready(net_forward(x_ragged, params_f32, tile_b=32))
    assert out_f32.shape == (50, n_output)
    assert jnp.allclose(out_f32, ref[:50], atol=1e-5, rtol=1e-5)

    print("KERNEL_OK")
</pallas_src>

<mosaic_0001>
module attributes {stable_mosaic.version = 11 : i64} {
  func.func @_mlp_kernel(%arg0: i32, %arg1: memref<32x16xf32, #tpu.memory_space<vmem>>, %arg2: memref<16x128xbf16, #tpu.memory_space<vmem>>, %arg3: memref<1x128xf32, #tpu.memory_space<vmem>>, %arg4: memref<128x4xbf16, #tpu.memory_space<vmem>>, %arg5: memref<1x4xf32, #tpu.memory_space<vmem>>, %arg6: memref<32x4xf32, #tpu.memory_space<vmem>>) attributes {dimension_semantics = [#tpu.dimension_semantics<parallel>], iteration_bounds = array<i64: 2>, scalar_prefetch = 0 : i64, scratch_operands = 0 : i64, tpu.core_type = #tpu.core_type<tc>, window_params = [{transform_indices = @transform_0, window_bounds = array<i64: 32, 16>}, {pipeline_mode = #tpu.pipeline_mode<synchronous>, transform_indices = @transform_1, window_bounds = array<i64: 16, 128>}, {pipeline_mode = #tpu.pipeline_mode<synchronous>, transform_indices = @transform_2, window_bounds = array<i64: 1, 128>}, {pipeline_mode = #tpu.pipeline_mode<synchronous>, transform_indices = @transform_3, window_bounds = array<i64: 128, 4>}, {pipeline_mode = #tpu.pipeline_mode<synchronous>, transform_indices = @transform_4, window_bounds = array<i64: 1, 4>}, {transform_indices = @transform_5, window_bounds = array<i64: 32, 4>}]} {
    %c0 = arith.constant 0 : index
    %c0_0 = arith.constant 0 : index
    %0 = vector.load %arg1[%c0, %c0_0] : memref<32x16xf32, #tpu.memory_space<vmem>>, vector<32x16xf32>
    %1 = arith.truncf %0 : vector<32x16xf32> to vector<32x16xbf16>
    %c0_1 = arith.constant 0 : index
    %c0_2 = arith.constant 0 : index
    %2 = vector.load %arg2[%c0_1, %c0_2] : memref<16x128xbf16, #tpu.memory_space<vmem>>, vector<16x128xbf16>
    %cst = arith.constant dense<0.000000e+00> : vector<32x128xf32>
    %3 = tpu.matmul %1, %2, %cst {dimension_numbers = #tpu.dot_dimension_numbers<[1], [0], [0], [1], [0, 0, 1, 1], [], []>} : vector<32x16xbf16>, vector<16x128xbf16>, vector<32x128xf32> -> vector<32x128xf32>
    %c0_3 = arith.constant 0 : index
    %c0_4 = arith.constant 0 : index
    %4 = vector.load %arg3[%c0_3, %c0_4] : memref<1x128xf32, #tpu.memory_space<vmem>>, vector<1x128xf32>
    %5 = vector.broadcast %4 : vector<1x128xf32> to vector<32x128xf32>
    %6 = arith.addf %3, %5 : vector<32x128xf32>
    %cst_5 = arith.constant 0.000000e+00 : f32
    %7 = vector.broadcast %cst_5 : f32 to vector<32x128xf32>
    %8 = arith.maximumf %6, %7 : vector<32x128xf32>
    %9 = arith.truncf %8 : vector<32x128xf32> to vector<32x128xbf16>
    %c0_6 = arith.constant 0 : index
    %c0_7 = arith.constant 0 : index
    %10 = vector.load %arg4[%c0_6, %c0_7] : memref<128x4xbf16, #tpu.memory_space<vmem>>, vector<128x4xbf16>
    %cst_8 = arith.constant dense<0.000000e+00> : vector<32x4xf32>
    %11 = tpu.matmul %9, %10, %cst_8 {dimension_numbers = #tpu.dot_dimension_numbers<[1], [0], [0], [1], [0, 0, 1, 1], [], []>} : vector<32x128xbf16>, vector<128x4xbf16>, vector<32x4xf32> -> vector<32x4xf32>
    %c0_9 = arith.constant 0 : index
    %c0_10 = arith.constant 0 : index
    %12 = vector.load %arg5[%c0_9, %c0_10] : memref<1x4xf32, #tpu.memory_space<vmem>>, vector<1x4xf32>
    %13 = vector.broadcast %12 : vector<1x4xf32> to vector<32x4xf32>
    %14 = arith.addf %11, %13 : vector<32x4xf32>
    %c0_11 = arith.constant 0 : index
    %c0_12 = arith.constant 0 : index
    %15 = vector.load %arg6[%c0_11, %c0_12] : memref<32x4xf32, #tpu.memory_space<vmem>>, vector<32x4xf32>
    tpu.vector_store %arg6[%c0_11, %c0_12], %14 {strides = array<i32>} : memref<32x4xf32, #tpu.memory_space<vmem>>, vector<32x4xf32>,
    return
  }
  func.func @transform_0(%arg0: i32) -> (i32, i32) {
    %c0_i32 = arith.constant 0 : i32
    %c0_i32_0 = arith.constant 0 : i32
    return %arg0, %c0_i32 : i32, i32
  }
  func.func @transform_1(%arg0: i32) -> (i32, i32) {
    %c0_i32 = arith.constant 0 : i32
    %c0_i32_0 = arith.constant 0 : i32
    %c0_i32_1 = arith.constant 0 : i32
    return %c0_i32, %c0_i32_0 : i32, i32
  }
  func.func @transform_2(%arg0: i32) -> (i32, i32) {
    %c0_i32 = arith.constant 0 : i32
    %c0_i32_0 = arith.constant 0 : i32
    %c0_i32_1 = arith.constant 0 : i32
    return %c0_i32, %c0_i32_0 : i32, i32
  }
  func.func @transform_3(%arg0: i32) -> (i32, i32) {
    %c0_i32 = arith.constant 0 : i32
    %c0_i32_0 = arith.constant 0 : i32
    %c0_i32_1 = arith.constant 0 : i32
    return %c0_i32, %c0_i32_0 : i32, i32
  }
  func.func @transform_4(%arg0: i32) -> (i32, i32) {
    %c0_i32 = arith.constant 0 : i32
    %c0_i32_0 = arith.constant 0 : i32
    %c0_i32_1 = arith.constant 0 : i32
    return %c0_i32, %c0_i32_0 : i32, i32
  }
  func.func @transform_5(%arg0: i32) -> (i32, i32) {
    %c0_i32 = arith.constant 0 : i32
    %c0_i32_0 = arith.constant 0 : i32
    return %arg0, %c0_i32 : i32, i32
  }
}

module attributes {stable_mosaic.version = 11 : i64} {
  func.func @_mlp_kernel(%arg0: i32, %arg1: memref<32x16xf32, #tpu.memory_space<vmem>>, %arg2: memref<16x128xbf16, #tpu.memory_space<vmem>>, %arg3: memref<1x128xf32, #tpu.memory_space<vmem>>, %arg4: memref<128x4xbf16, #tpu.memory_space<vmem>>, %arg5: memref<1x4xf32, #tpu.memory_space<vmem>>, %arg6: memref<32x4xf32, #tpu.memory_space<vmem>>) attributes {dimension_semantics = [#tpu.dimension_semantics<parallel>], iteration_bounds = array<i64: 2>, scalar_prefetch = 0 : i64, scratch_operands = 0 : i64, tpu.core_type = #tpu.core_type<tc>, window_params = [{transform_indices = @transform_0, window_bounds = array<i64: 32, 16>}, {pipeline_mode = #tpu.pipeline_mode<synchronous>, transform_indices = @transform_1, window_bounds = array<i64: 16, 128>}, {pipeline_mode = #tpu.pipeline_mode<synchronous>, transform_indices = @transform_2, window_bounds = array<i64: 1, 128>}, {pipeline_mode = #tpu.pipeline_mode<synchronous>, transform_indices = @transform_3, window_bounds = array<i64: 128, 4>}, {pipeline_mode = #tpu.pipeline_mode<synchronous>, transform_indices = @transform_4, window_bounds = array<i64: 1, 4>}, {transform_indices = @transform_5, window_bounds = array<i64: 32, 4>}]} {
    %c0 = arith.constant 0 : index
    %c0_0 = arith.constant 0 : index
    %0 = vector.load %arg1[%c0, %c0_0] : memref<32x16xf32, #tpu.memory_space<vmem>>, vector<32x16xf32>
    %1 = arith.truncf %0 : vector<32x16xf32> to vector<32x16xbf16>
    %c0_1 = arith.constant 0 : index
    %c0_2 = arith.constant 0 : index
    %2 = vector.load %arg2[%c0_1, %c0_2] : memref<16x128xbf16, #tpu.memory_space<vmem>>, vector<16x128xbf16>
    %cst = arith.constant dense<0.000000e+00> : vector<32x128xf32>
    %3 = tpu.matmul %1, %2, %cst {dimension_numbers = #tpu.dot_dimension_numbers<[1], [0], [0], [1], [0, 0, 1, 1], [], []>} : vector<32x16xbf16>, vector<16x128xbf16>, vector<32x128xf32> -> vector<32x128xf32>
    %c0_3 = arith.constant 0 : index
    %c0_4 = arith.constant 0 : index
    %4 = vector.load %arg3[%c0_3, %c0_4] : memref<1x128xf32, #tpu.memory_space<vmem>>, vector<1x128xf32>
    %5 = vector.broadcast %4 : vector<1x128xf32> to vector<32x128xf32>
    %6 = arith.addf %3, %5 : vector<32x128xf32>
    %cst_5 = arith.constant 0.000000e+00 : f32
    %7 = vector.broadcast %cst_5 : f32 to vector<32x128xf32>
    %8 = arith.maximumf %6, %7 : vector<32x128xf32>
    %9 = arith.truncf %8 : vector<32x128xf32> to vector<32x128xbf16>
    %c0_6 = arith.constant 0 : index
    %c0_7 = arith.constant 0 : index
    %10 = vector.load %arg4[%c0_6, %c0_7] : memref<128x4xbf16, #tpu.memory_space<vmem>>, vector<128x4xbf16>
    %cst_8 = arith.constant dense<0.000000e+00> : vector<32x4xf32>
    %11 = tpu.matmul %9, %10, %cst_8 {dimension_numbers = #tpu.dot_dimension_numbers<[1], [0], [0], [1], [0, 0, 1, 1], [], []>} : vector<32x128xbf16>, vector<128x4xbf16>, vector<32x4xf32> -> vector<32x4xf32>
    %c0_9 = arith.constant 0 : index
    %c0_10 = arith.constant 0 : index
    %12 = vector.load %arg5[%c0_9, %c0_10] : memref<1x4xf32, #tpu.memory_space<vmem>>, vector<1x4xf32>
    %13 = vector.broadcast %12 : vector<1x4xf32> to vector<32x4xf32>
    %14 = arith.addf %11, %13 : vector<32x4xf32>
    %c0_11 = arith.constant 0 : index
    %c0_12 = arith.constant 0 : index
    %15 = vector.load %arg6[%c0_11, %c0_12] : memref<32x4xf32, #tpu.memory_space<vmem>>, vector<32x4xf32>
    tpu.vector_store %arg6[%c0_11, %c0_12], %14 {strides = array<i32>} : memref<32x4xf32, #tpu.memory_space<vmem>>, vector<32x4xf32>,
    return
  }
  func.func @transform_0(%arg0: i32) -> (i32, i32) {
    %c0_i32 = arith.constant 0 : i32
    %c0_i32_0 = arith.constant 0 : i32
    return %arg0, %c0_i32 : i32, i32
  }
  func.func @transform_1(%arg0: i32) -> (i32, i32) {
    %c0_i32 = arith.constant 0 : i32
    %c0_i32_0 = arith.constant 0 : i32
    %c0_i32_1 = arith.constant 0 : i32
    return %c0_i32, %c0_i32_0 : i32, i32
  }
  func.func @transform_2(%arg0: i32) -> (i32, i32) {
    %c0_i32 = arith.constant 0 : i32
    %c0_i32_0 = arith.constant 0 : i32
    %c0_i32_1 = arith.constant 0 : i32
    return %c0_i32, %c0_i32_0 : i32, i32
  }
  func.func @transform_3(%arg0: i32) -> (i32, i32) {
    %c0_i32 = arith.constant 0 : i32
    %c0_i32_0 = arith.constant 0 : i32
    %c0_i32_1 = arith.constant 0 : i32
    return %c0_i32, %c0_i32_0 : i32, i32
  }
  func.func @transform_4(%arg0: i32) -> (i32, i32) {
    %c0_i32 = arith.constant 0 : i32
    %c0_i32_0 = arith.constant 0 : i32
    %c0_i32_1 = arith.constant 0 : i32
    return %c0_i32, %c0_i32_0 : i32, i32
  }
  func.func @transform_5(%arg0: i32) -> (i32, i32) {
    %c0_i32 = arith.constant 0 : i32
    %c0_i32_0 = arith.constant 0 : i32
    return %arg0, %c0_i32 : i32, i32
  }
}

</mosaic_0001>

<bundles_post_ra>
// kernel: tpu_custom_call.1
= control target key start
LH: loop header
LB: loop body
LE: loop exit
PB: predicated region body
PF: predicated region fallthrough
CT: control target
= control target key end

     0   :  { %s611_s18 = smov 0   ;;  %s668_s0 = inlined_call_operand.vmem [shape: f32[64,16], index: 0, kind: input, shape index: {}]   ;;  %s669_s1 = inlined_call_operand.vmem [shape: bf16[16,128], index: 1, kind: input, shape index: {}]   ;;  %s670_s2 = inlined_call_operand.vmem [shape: f32[1,128], index: 2, kind: input, shape index: {}]   ;;  %s671_s3 = inlined_call_operand.vmem [shape: bf16[128,4], index: 3, kind: input, shape index: {}]   ;;  %s672_s4 = inlined_call_operand.vmem [shape: f32[1,4], index: 4, kind: input, shape index: {}]   ;;  %s673_s5 = inlined_call_operand.vmem [shape: f32[64,4], index: 5, kind: output, shape index: {}]  }
   0x1 LB: > { %s493_s19 = sadd.s32 4294967295, %s579_s18   ;;  %p497_p0 = scmp.ge.s32.totalorder %s579_s18, 1  ;;  %s579_s18 = sphi %s611_s18, %s15_s18  }
   0x2   : > { %p188_p1 = scmp.lt.s32.totalorder %s579_s18, 3 }
   0x4   : > { %p189_p2 = pnand %p497_p0, %p188_p1 }
   0x5   : > { %v564_v0 = vld [vmem:[%s669_s1] sm:$0xff] (!%p189_p2)   ;;  %s498_s22 = sshll.u32 (!%p189_p2), %s493_s19, 2  ;;  %v566_v2 = vld [vmem:[%s671_s3 + $0x8] sm:$0xff] (!%p189_p2)   ;;  %v567_v3 = vld [vmem:[%s671_s3 + $0x10] sm:$0xff] (!%p189_p2)   ;;  %vm250_vm0 = vcmask (!%p189_p2), 130048   ;;  %vm432_vm1 = vcmask (!%p189_p2), 31744  }
   0x6   : > { %192 = sbr.rel (%p189_p2) target bundleno = 460 (0x1cc), region = 40  ;;  %p217_p3 = scmp.lt.s32.totalorder (!%p189_p2), %s498_s22, 7  ;;  %530 = vmatprep.subr.bf16.mxu0 (!%p189_p2), %v564_v0  ;;  %v565_v1 = vld [vmem:[%s671_s3] sm:$0xff] (!%p189_p2)   ;;  %v568_v10 = vld [vmem:[%s671_s3 + $0x18] sm:$0xff] (!%p189_p2)   ;;  %v570_v12 = vld [vmem:[%s671_s3 + $0x28] sm:$0xff] (!%p189_p2)  }
   0x7   : > { %531 = vmatpush3.bf16.msra.mxu0 (!%p189_p2), %v564_v0  ;;  %536 = vmatprep.subr.bf16.mxu1 (!%p189_p2), %v565_v1  ;;  %v569_v11 = vld [vmem:[%s671_s3 + $0x20] sm:$0xff] (!%p189_p2)   ;;  %v571_v13 = vld [vmem:[%s671_s3 + $0x30] sm:$0xff] (!%p189_p2)   ;;  %v572_v14 = vld [vmem:[%s671_s3 + $0x38] sm:$0xff] (!%p189_p2)  }
   0x8   : > { %537 = vmatpush3.bf16.msra.mxu1 (!%p189_p2), %v565_v1  ;;  %v502_v15 = vld [vmem:[%s670_s2] ss:$0 sm:$0xff] (!%p189_p2) }
   0x9   : > { %538 = vmatprep.subr.bf16.mxu1 (!%p189_p2), %v566_v2  ;;  %v506_v30 = vld [vmem:[%s672_s4] ss:$0 sm:$0xff] (!%p189_p2) }
   0xc   : > { %539 = vmatpush3.bf16.msra.mxu1 (!%p189_p2), %v566_v2 }
   0xd   : > { %s675_s22 = smov (!%p217_p3, %s498_s22), 7  ;;  %540 = vmatprep.subr.bf16.mxu1 %v567_v3 }
   0xe   : > { %s499_s27 = sshll.u32 %s675_s22, 3 }
   0xf   : > { %s220_s30 = scalar_lea.vmem %s668_s0, %s499_s27  ;;  %s226_s26 = scalar_lea.vmem %s673_s5, %s499_s27 }
  0x10   : > { %v229_v4 = vld [vmem:[%s220_s30] sm:$0xff]  ;;  %v230_v5 = vld [vmem:[%s220_s30 + $0x8] sm:$0xff]  ;;  %v231_v6 = vld [vmem:[%s220_s30 + $0x10] sm:$0xff]  ;;  %541 = vmatpush3.bf16.msra.mxu1 %v567_v3 }
  0x11   : > { %v233_v7 = vpack.c.bf16 %v230_v5, %v229_v4  ;;  %v232_v8 = vld [vmem:[%s220_s30 + $0x18] sm:$0xff]  ;;  %542 = vmatprep.subr.bf16.mxu1 %v568_v10 }
  0x12   : > { %v234_v9 = vpack.c.bf16 %v232_v8, %v231_v6 }
  0x13   : > { %532 = vmatprep.mubr.msk.bf16.mxu0 %vm250_vm0, %v233_v7 }
  0x14   : > { %533 = vmatmul.mubr.msk.bf16.vlgmr.msra.gmra.mrb[0].mxu0 %vm250_vm0, %v234_v9  ;;  %543 = vmatpush3.bf16.msra.mxu1 %v568_v10 }
  0x15   : > { %544 = vmatprep.subr.bf16.mxu1 %v569_v11 }
  0x18   : > { %545 = vmatpush3.bf16.msra.mxu1 %v569_v11 }
  0x19   : > { %546 = vmatprep.subr.bf16.mxu1 %v570_v12 }
  0x1c   : > { %547 = vmatpush3.bf16.msra.mxu1 %v570_v12 }
  0x1d   : > { %548 = vmatprep.subr.bf16.mxu1 %v571_v13 }
  0x20   : > { %549 = vmatpush3.bf16.msra.mxu1 %v571_v13 }
  0x21   : > { %550 = vmatprep.subr.bf16.mxu1 %v572_v14 }
  0x24   : > { %551 = vmatpush3.bf16.msra.mxu1 %v572_v14 }
  0xe7   : > { %v534_v16 = vpop.f32.mrb[0].mxu0 }
  0xe8   : > { %v300_v17 = vadd.f32 %v534_v16, %v502_v15  ;;  %v291_v18 = vpop.f32.mrb[1].mxu0 }
  0xe9   : > { %v292_v19 = vadd.f32 %v502_v15, %v291_v18  ;;  %v535_v20 = vpop.f32.mrb[2].mxu0 }
  0xea   : > { %v303_v21 = vadd.f32 %v535_v20, %v502_v15  ;;  %v294_v22 = vpop.f32.mrb[3].mxu0  ;;  %v308_v24 = vmax.f32 %v300_v17, 0.0 }
  0xeb   : > { %v295_v23 = vadd.f32 %v502_v15, %v294_v22  ;;  %v306_v26 = vmax.f32 %v292_v19, 0.0 }
  0xec   : > { %v309_v25 = vmax.f32 %v303_v21, 0.0 }
  0xed   : > { %v307_v27 = vmax.f32 %v295_v23, 0.0 }
  0xee   : > { %v311_v28 = vpack.c.bf16 %v309_v25, %v308_v24 }
  0xef   : > { %v310_v29 = vpack.c.bf16 %v307_v27, %v306_v26 }
  0xf1   : > { %552 = vmatprep.mubr.bf16.mxu1 %v310_v29 }
  0xf2   : > { %553 = vmatmul.mubr.bf16.vlgmr.msra.gmra.mrb[0].mxu1 %v311_v28 }
 0x1c5   : > { %v554_v31 = vpop.f32.mrb[0].mxu1 }
 0x1c6   : > { %v417_v32 = vpop.f32.mrb[1].mxu1  ;;  %v426_v37 = vadd.f32 %v554_v31, %v506_v30 }
 0x1c7   : > { %v418_v33 = vadd.f32 %v506_v30, %v417_v32  ;;  %v555_v34 = vpop.f32.mrb[2].mxu1 }
 0x1c8   : > { %v420_v35 = vpop.f32.mrb[3].mxu1  ;;  %v429_v38 = vadd.f32 %v555_v34, %v506_v30  ;;  %435 = vst.msk [vmem:[%s226_s26 + $0x10] sm:$0xff] %vm432_vm1, %v426_v37 }
 0x1c9   : > { %433 = vst.msk [vmem:[%s226_s26] sm:$0xff] %vm432_vm1, %v418_v33  ;;  %v421_v36 = vadd.f32 %v506_v30, %v420_v35 }
 0x1ca   : > { %436 = vst.msk [vmem:[%s226_s26 + $0x18] sm:$0xff] %vm432_vm1, %v429_v38 }
 0x1cb   : > { %434 = vst.msk [vmem:[%s226_s26 + $0x8] sm:$0xff] %vm432_vm1, %v421_v36 }
 0x1cc PF: > { %s15_s18 = sadd.s32 1, %s579_s18  }
 0x1cd   : > { %p12_p4 = scmp.ge.s32.totalorder %s15_s18, 4  }
 0x1cf   :  { %14 = sbr.rel (!%p12_p4) target bundleno = 1 (0x1), region = 70 }

// kernel: tpu_custom_call.1
= control target key start
LH: loop header
LB: loop body
LE: loop exit
PB: predicated region body
PF: predicated region fallthrough
CT: control target
= control target key end

     0   :  { %s611_s18 = smov 0   ;;  %s668_s0 = inlined_call_operand.vmem [shape: f32[64,16], index: 0, kind: input, shape index: {}]   ;;  %s669_s1 = inlined_call_operand.vmem [shape: bf16[16,128], index: 1, kind: input, shape index: {}]   ;;  %s670_s2 = inlined_call_operand.vmem [shape: f32[1,128], index: 2, kind: input, shape index: {}]   ;;  %s671_s3 = inlined_call_operand.vmem [shape: bf16[128,4], index: 3, kind: input, shape index: {}]   ;;  %s672_s4 = inlined_call_operand.vmem [shape: f32[1,4], index: 4, kind: input, shape index: {}]   ;;  %s673_s5 = inlined_call_operand.vmem [shape: f32[64,4], index: 5, kind: output, shape index: {}]  }
   0x1 LB: > { %s493_s19 = sadd.s32 4294967295, %s579_s18   ;;  %p497_p0 = scmp.ge.s32.totalorder %s579_s18, 1  ;;  %s579_s18 = sphi %s611_s18, %s15_s18  }
   0x2   : > { %p188_p1 = scmp.lt.s32.totalorder %s579_s18, 3 }
   0x4   : > { %p189_p2 = pnand %p497_p0, %p188_p1 }
   0x5   : > { %v564_v0 = vld [vmem:[%s669_s1] sm:$0xff] (!%p189_p2)   ;;  %s498_s22 = sshll.u32 (!%p189_p2), %s493_s19, 2  ;;  %v566_v2 = vld [vmem:[%s671_s3 + $0x8] sm:$0xff] (!%p189_p2)   ;;  %v567_v3 = vld [vmem:[%s671_s3 + $0x10] sm:$0xff] (!%p189_p2)   ;;  %vm250_vm0 = vcmask (!%p189_p2), 130048   ;;  %vm432_vm1 = vcmask (!%p189_p2), 31744  }
   0x6   : > { %192 = sbr.rel (%p189_p2) target bundleno = 460 (0x1cc), region = 40  ;;  %p217_p3 = scmp.lt.s32.totalorder (!%p189_p2), %s498_s22, 7  ;;  %530 = vmatprep.subr.bf16.mxu0 (!%p189_p2), %v564_v0  ;;  %v565_v1 = vld [vmem:[%s671_s3] sm:$0xff] (!%p189_p2)   ;;  %v568_v10 = vld [vmem:[%s671_s3 + $0x18] sm:$0xff] (!%p189_p2)   ;;  %v570_v12 = vld [vmem:[%s671_s3 + $0x28] sm:$0xff] (!%p189_p2)  }
   0x7   : > { %531 = vmatpush3.bf16.msra.mxu0 (!%p189_p2), %v564_v0  ;;  %536 = vmatprep.subr.bf16.mxu1 (!%p189_p2), %v565_v1  ;;  %v569_v11 = vld [vmem:[%s671_s3 + $0x20] sm:$0xff] (!%p189_p2)   ;;  %v571_v13 = vld [vmem:[%s671_s3 + $0x30] sm:$0xff] (!%p189_p2)   ;;  %v572_v14 = vld [vmem:[%s671_s3 + $0x38] sm:$0xff] (!%p189_p2)  }
   0x8   : > { %537 = vmatpush3.bf16.msra.mxu1 (!%p189_p2), %v565_v1  ;;  %v502_v15 = vld [vmem:[%s670_s2] ss:$0 sm:$0xff] (!%p189_p2) }
   0x9   : > { %538 = vmatprep.subr.bf16.mxu1 (!%p189_p2), %v566_v2  ;;  %v506_v30 = vld [vmem:[%s672_s4] ss:$0 sm:$0xff] (!%p189_p2) }
   0xc   : > { %539 = vmatpush3.bf16.msra.mxu1 (!%p189_p2), %v566_v2 }
   0xd   : > { %s675_s22 = smov (!%p217_p3, %s498_s22), 7  ;;  %540 = vmatprep.subr.bf16.mxu1 %v567_v3 }
   0xe   : > { %s499_s27 = sshll.u32 %s675_s22, 3 }
   0xf   : > { %s220_s30 = scalar_lea.vmem %s668_s0, %s499_s27  ;;  %s226_s26 = scalar_lea.vmem %s673_s5, %s499_s27 }
  0x10   : > { %v229_v4 = vld [vmem:[%s220_s30] sm:$0xff]  ;;  %v230_v5 = vld [vmem:[%s220_s30 + $0x8] sm:$0xff]  ;;  %v231_v6 = vld [vmem:[%s220_s30 + $0x10] sm:$0xff]  ;;  %541 = vmatpush3.bf16.msra.mxu1 %v567_v3 }
  0x11   : > { %v233_v7 = vpack.c.bf16 %v230_v5, %v229_v4  ;;  %v232_v8 = vld [vmem:[%s220_s30 + $0x18] sm:$0xff]  ;;  %542 = vmatprep.subr.bf16.mxu1 %v568_v10 }
  0x12   : > { %v234_v9 = vpack.c.bf16 %v232_v8, %v231_v6 }
  0x13   : > { %532 = vmatprep.mubr.msk.bf16.mxu0 %vm250_vm0, %v233_v7 }
  0x14   : > { %533 = vmatmul.mubr.msk.bf16.vlgmr.msra.gmra.mrb[0].mxu0 %vm250_vm0, %v234_v9  ;;  %543 = vmatpush3.bf16.msra.mxu1 %v568_v10 }
  0x15   : > { %544 = vmatprep.subr.bf16.mxu1 %v569_v11 }
  0x18   : > { %545 = vmatpush3.bf16.msra.mxu1 %v569_v11 }
  0x19   : > { %546 = vmatprep.subr.bf16.mxu1 %v570_v12 }
  0x1c   : > { %547 = vmatpush3.bf16.msra.mxu1 %v570_v12 }
  0x1d   : > { %548 = vmatprep.subr.bf16.mxu1 %v571_v13 }
  0x20   : > { %549 = vmatpush3.bf16.msra.mxu1 %v571_v13 }
  0x21   : > { %550 = vmatprep.subr.bf16.mxu1 %v572_v14 }
  0x24   : > { %551 = vmatpush3.bf16.msra.mxu1 %v572_v14 }
  0xe7   : > { %v534_v16 = vpop.f32.mrb[0].mxu0 }
  0xe8   : > { %v300_v17 = vadd.f32 %v534_v16, %v502_v15  ;;  %v291_v18 = vpop.f32.mrb[1].mxu0 }
  0xe9   : > { %v292_v19 = vadd.f32 %v502_v15, %v291_v18  ;;  %v535_v20 = vpop.f32.mrb[2].mxu0 }
  0xea   : > { %v303_v21 = vadd.f32 %v535_v20, %v502_v15  ;;  %v294_v22 = vpop.f32.mrb[3].mxu0  ;;  %v308_v24 = vmax.f32 %v300_v17, 0.0 }
  0xeb   : > { %v295_v23 = vadd.f32 %v502_v15, %v294_v22  ;;  %v306_v26 = vmax.f32 %v292_v19, 0.0 }
  0xec   : > { %v309_v25 = vmax.f32 %v303_v21, 0.0 }
  0xed   : > { %v307_v27 = vmax.f32 %v295_v23, 0.0 }
  0xee   : > { %v311_v28 = vpack.c.bf16 %v309_v25, %v308_v24 }
  0xef   : > { %v310_v29 = vpack.c.bf16 %v307_v27, %v306_v26 }
  0xf1   : > { %552 = vmatprep.mubr.bf16.mxu1 %v310_v29 }
  0xf2   : > { %553 = vmatmul.mubr.bf16.vlgmr.msra.gmra.mrb[0].mxu1 %v311_v28 }
 0x1c5   : > { %v554_v31 = vpop.f32.mrb[0].mxu1 }
 0x1c6   : > { %v417_v32 = vpop.f32.mrb[1].mxu1  ;;  %v426_v37 = vadd.f32 %v554_v31, %v506_v30 }
 0x1c7   : > { %v418_v33 = vadd.f32 %v506_v30, %v417_v32  ;;  %v555_v34 = vpop.f32.mrb[2].mxu1 }
 0x1c8   : > { %v420_v35 = vpop.f32.mrb[3].mxu1  ;;  %v429_v38 = vadd.f32 %v555_v34, %v506_v30  ;;  %435 = vst.msk [vmem:[%s226_s26 + $0x10] sm:$0xff] %vm432_vm1, %v426_v37 }
 0x1c9   : > { %433 = vst.msk [vmem:[%s226_s26] sm:$0xff] %vm432_vm1, %v418_v33  ;;  %v421_v36 = vadd.f32 %v506_v30, %v420_v35 }
 0x1ca   : > { %436 = vst.msk [vmem:[%s226_s26 + $0x18] sm:$0xff] %vm432_vm1, %v429_v38 }
 0x1cb   : > { %434 = vst.msk [vmem:[%s226_s26 + $0x8] sm:$0xff] %vm432_vm1, %v421_v36 }
 0x1cc PF: > { %s15_s18 = sadd.s32 1, %s579_s18  }
 0x1cd   : > { %p12_p4 = scmp.ge.s32.totalorder %s15_s18, 4  }
 0x1cf   :  { %14 = sbr.rel (!%p12_p4) target bundleno = 1 (0x1), region = 70 }

</bundles_post_ra>
